<compile_context>
chip_gen: v7x
topology: tpu7x:2x2x1
jax: 0.10.0
libtpu: 0.0.40
codegen_flags: <defaults>
</compile_context>

<pallas_src>
import jax
import jax.numpy as jnp
from jax.experimental import pallas as pl
from jax.experimental.pallas import tpu as pltpu


def _graph_conv_kernel(wx_ref, a_ref, b_ref, o_ref):
    # wx_ref: (B*Cout, N)   bf16, conv already folded in, resident across tiles
    # a_ref:  (N, TN)       bf16, column tile of A_sum = sum_i adj_i
    # b_ref:  (B*Cout, 1)   f32,  num_adj * bias (torch adds bias once per adjacency)
    # o_ref:  (B*Cout, TN)  f32 output tile
    y = jnp.dot(wx_ref[...], a_ref[...], preferred_element_type=jnp.float32) + b_ref[...]
    o_ref[...] = jnp.maximum(y, 0.0)  # ReLU


def _pick_tn(n, rows_out):
    """Column-tile width for the adjacency stream (VMEM-budgeted)."""
    if n % 128 != 0:
        # TODO(synk): pad N up to a multiple of 128 for large lane-unaligned graphs.
        return n
    if n <= 2048:
        return n  # whole adjacency fits easily -> grid of 1, no per-step overhead
    budget = 20 << 20  # conservative: fits the 32 MiB scoped VMEM on v6e/v7x
    for tn in (1024, 512, 256, 128):
        if n % tn != 0:
            continue
        a_bytes = 2 * n * tn * 2          # double-buffered bf16 A tile
        o_bytes = 2 * rows_out * tn * 4   # double-buffered f32 output tile
        wx_bytes = rows_out * n * 2       # resident bf16 wx
        if a_bytes + o_bytes + wx_bytes <= budget:
            return tn
    return 128


@jax.jit
def graph_conv_pallas(x_nchw, adj_stack, weight, bias):
    """x_nchw: (B, C_in, sides, sides); adj_stack: (A, N, N) with N = sides*sides;
    weight: (C_out, C_in) (squeezed 1x1 Conv2d weight); bias: (C_out,)."""
    B, Cin, H, W = x_nchw.shape
    N = H * W
    num_adj = adj_stack.shape[0]
    Cout = weight.shape[0]

    # Fold the 1x1 conv into x (tiny vs. the N^2 adjacency stream): (B*Cout, N) bf16.
    x3 = x_nchw.reshape(B, Cin, N).astype(jnp.float32)
    wx = jnp.einsum("oc,bcn->bon", weight.astype(jnp.float32), x3)
    wx = wx.reshape(B * Cout, N).astype(jnp.bfloat16)

    # The conv is linear, so sum_i conv(x @ A_i) == (W x) @ (sum_i A_i) + num_adj*b.
    # TODO(synk): if the adjacency stack is static across calls, hoist/cache this
    # bf16 A_sum outside the forward instead of recomputing it every call.
    a_sum = jnp.sum(adj_stack, axis=0).astype(jnp.bfloat16)             # (N, N)

    # Bias is added once per adjacency in the torch loop -> scale by num_adj.
    b_col = jnp.tile(bias.astype(jnp.float32) * num_adj, B).reshape(B * Cout, 1)

    TN = _pick_tn(N, B * Cout)
    grid = (N // TN,)

    out2 = pl.pallas_call(
        _graph_conv_kernel,
        out_shape=jax.ShapeDtypeStruct((B * Cout, N), jnp.float32),
        grid=grid,
        in_specs=[
            pl.BlockSpec((B * Cout, N), lambda j: (0, 0)),    # wx, fully resident
            pl.BlockSpec((N, TN), lambda j: (0, j)),          # A_sum column tile
            pl.BlockSpec((B * Cout, 1), lambda j: (0, 0)),    # num_adj * bias
        ],
        out_specs=pl.BlockSpec((B * Cout, TN), lambda j: (0, j)),
        compiler_params=pltpu.CompilerParams(
            dimension_semantics=("parallel",),   # uses both TCs on v7x when grid > 1
            vmem_limit_bytes=32 << 20,           # lift v5e's 16 MiB scoped default
        ),
    )(wx, a_sum, b_col)

    return out2.reshape(B, Cout, H, W)  # back to NCHW


def graph_conv_ref(x_nchw, adj_stack, weight, bias):
    """Pure-JAX f32 reference matching the PyTorch forward exactly."""
    B, Cin, H, W = x_nchw.shape
    N = H * W
    xf = x_nchw.reshape(B * Cin, N)
    out = None
    for i in range(adj_stack.shape[0]):
        xa = xf @ adj_stack[i]
        xa = xa.reshape(B, Cin, H, W)
        y = jnp.einsum("oc,bchw->bohw", weight, xa) + bias[None, :, None, None]
        out = y if out is None else out + y
    return jax.nn.relu(out)


if __name__ == "__main__":
    B, Cin, Cout = 2, 4, 8
    sides = 16
    num_node = sides * sides      # 256 graph nodes
    A = 3                         # number of adjacency matrices

    key = jax.random.PRNGKey(0)
    k1, k2, k3, k4 = jax.random.split(key, 4)
    x = jax.random.normal(k1, (B, Cin, sides, sides), dtype=jnp.float32)
    adj = jax.random.normal(k2, (A, num_node, num_node), dtype=jnp.float32) * 0.1
    # nn.Conv2d(in, out, kernel_size=(1,1)) weight is (Cout, Cin, 1, 1); use squeezed form.
    weight = jax.random.normal(k3, (Cout, Cin), dtype=jnp.float32) * 0.5
    bias = jax.random.normal(k4, (Cout,), dtype=jnp.float32) * 0.1

    out = graph_conv_pallas(x, adj, weight, bias)
    out = jax.block_until_ready(out)

    ref = graph_conv_ref(x, adj, weight, bias)
    assert out.shape == (B, Cout, sides, sides)
    # bf16 kernel operands (per perf review) vs f32 reference: allow bf16-level error.
    assert jnp.allclose(out, ref, atol=3e-2, rtol=3e-2), "mismatch vs reference"
    print("KERNEL_OK")
</pallas_src>

<mosaic_0001>
module attributes {stable_mosaic.version = 11 : i64} {
  func.func @_graph_conv_kernel(%arg0: i32, %arg1: memref<16x256xbf16, #tpu.memory_space<vmem>>, %arg2: memref<256x256xbf16, #tpu.memory_space<vmem>>, %arg3: memref<16x1xf32, #tpu.memory_space<vmem>>, %arg4: memref<16x256xf32, #tpu.memory_space<vmem>>) attributes {dimension_semantics = [#tpu.dimension_semantics<parallel>], iteration_bounds = array<i64: 1>, scalar_prefetch = 0 : i64, scratch_operands = 0 : i64, tpu.core_type = #tpu.core_type<tc>, window_params = [{pipeline_mode = #tpu.pipeline_mode<synchronous>, transform_indices = @transform_0, window_bounds = array<i64: 16, 256>}, {transform_indices = @transform_1, window_bounds = array<i64: 256, 256>}, {pipeline_mode = #tpu.pipeline_mode<synchronous>, transform_indices = @transform_2, window_bounds = array<i64: 16, 1>}, {transform_indices = @transform_3, window_bounds = array<i64: 16, 256>}]} {
    %c0 = arith.constant 0 : index
    %c0_0 = arith.constant 0 : index
    %0 = vector.load %arg1[%c0, %c0_0] : memref<16x256xbf16, #tpu.memory_space<vmem>>, vector<16x256xbf16>
    %c0_1 = arith.constant 0 : index
    %c0_2 = arith.constant 0 : index
    %1 = vector.load %arg2[%c0_1, %c0_2] : memref<256x256xbf16, #tpu.memory_space<vmem>>, vector<256x256xbf16>
    %cst = arith.constant dense<0.000000e+00> : vector<16x256xf32>
    %2 = tpu.matmul %0, %1, %cst {dimension_numbers = #tpu.dot_dimension_numbers<[1], [0], [0], [1], [0, 0, 1, 1], [], []>} : vector<16x256xbf16>, vector<256x256xbf16>, vector<16x256xf32> -> vector<16x256xf32>
    %c0_3 = arith.constant 0 : index
    %c0_4 = arith.constant 0 : index
    %3 = vector.load %arg3[%c0_3, %c0_4] : memref<16x1xf32, #tpu.memory_space<vmem>>, vector<16x1xf32>
    %4 = vector.broadcast %3 : vector<16x1xf32> to vector<16x256xf32>
    %5 = arith.addf %2, %4 : vector<16x256xf32>
    %cst_5 = arith.constant 0.000000e+00 : f32
    %6 = vector.broadcast %cst_5 : f32 to vector<16x256xf32>
    %7 = arith.maximumf %5, %6 : vector<16x256xf32>
    %c0_6 = arith.constant 0 : index
    %c0_7 = arith.constant 0 : index
    %8 = vector.load %arg4[%c0_6, %c0_7] : memref<16x256xf32, #tpu.memory_space<vmem>>, vector<16x256xf32>
    tpu.vector_store %arg4[%c0_6, %c0_7], %7 {strides = array<i32>} : memref<16x256xf32, #tpu.memory_space<vmem>>, vector<16x256xf32>,
    return
  }
  func.func @transform_0(%arg0: i32) -> (i32, i32) {
    %c0_i32 = arith.constant 0 : i32
    %c0_i32_0 = arith.constant 0 : i32
    %c0_i32_1 = arith.constant 0 : i32
    return %c0_i32, %c0_i32_0 : i32, i32
  }
  func.func @transform_1(%arg0: i32) -> (i32, i32) {
    %c0_i32 = arith.constant 0 : i32
    %c0_i32_0 = arith.constant 0 : i32
    return %c0_i32, %arg0 : i32, i32
  }
  func.func @transform_2(%arg0: i32) -> (i32, i32) {
    %c0_i32 = arith.constant 0 : i32
    %c0_i32_0 = arith.constant 0 : i32
    %c0_i32_1 = arith.constant 0 : i32
    return %c0_i32, %c0_i32_0 : i32, i32
  }
  func.func @transform_3(%arg0: i32) -> (i32, i32) {
    %c0_i32 = arith.constant 0 : i32
    %c0_i32_0 = arith.constant 0 : i32
    return %c0_i32, %arg0 : i32, i32
  }
}

</mosaic_0001>

<bundles_post_ra>
// kernel: tile.8
= control target key start
LH: loop header
LB: loop body
LE: loop exit
PB: predicated region body
PF: predicated region fallthrough
CT: control target
= control target key end

     0   :  { %s22_s0 = inlined_call_operand.vmem [shape: f32[8], index: 0, kind: input, shape index: {}]   ;;  %s23_s1 = inlined_call_operand.vmem [shape: f32[2,8], index: 1, kind: output, shape index: {}]  }
   0x1   :  { %v4_v0 = vld [vmem:[%s22_s0] ss:$0 sm:$0xff] }
   0x2   :  { %5 = vst [vmem:[%s23_s1] sm:$0x3] %v4_v0 }

// kernel: tile.0
= control target key start
LH: loop header
LB: loop body
LE: loop exit
PB: predicated region body
PF: predicated region fallthrough
CT: control target
= control target key end

     0   :  { %s66_s8 = smov 125   ;;  %vm7_vm0 = vcmask 7168   ;;  %s67_s11 = smov 126   ;;  %s117_s0 = inlined_call_operand.vmem [shape: f32[2,8], index: 0, kind: input, shape index: {}]   ;;  %s118_s1 = inlined_call_operand.vmem [shape: f32[16,1], index: 1, kind: output, shape index: {}]  }
   0x1   :  { %v4_v0 = vld [vmem:[%s117_s0] sm:$0x3]  ;;  %s65_s0 = smov 127   ;;  %s68_s12 = smov 124  }
   0x2   :  { %5 = vst [vmem:[#allocation0] sm:$0x3] %v4_v0  ;;  %s69_s13 = smov 123   ;;  %s70_s14 = smov 122  }
   0x3   :  { %s71_s15 = smov 121  }
   0x9   :  { %v9_v1 = vld [vmem:[#allocation0] sm:$0x3]  }
   0xa   :  { %v21_v2 = vld [vmem:[#allocation0] sm:$0x3]   ;;  %10 = vrot.lane.b32.xlu0 %v9_v1, %s65_s0 }
   0xb   :  { %22 = vrot.lane.b32.xlu1 %v21_v2, %s66_s8  ;;  %v15_v3 = vld [vmem:[#allocation0] sm:$0x3]  }
   0xc   :  { %v27_v4 = vld [vmem:[#allocation0] sm:$0x3]  }
   0xd   :  { %v6_v5 = vld [vmem:[#allocation0] sm:$0x3]  }
   0xe   :  { %8 = vst.msk [vmem:[%s118_s1] ss:$8 sm:$0x3] %vm7_vm0, %v6_v5   ;;  %16 = vrot.lane.b32.xlu0 %v15_v3, %s67_s11  ;;  %v33_v6 = vld [vmem:[#allocation0] sm:$0x3]  }
   0xf   :  { %28 = vrot.lane.b32.xlu1 %v27_v4, %s68_s12  ;;  %v39_v7 = vld [vmem:[#allocation0] sm:$0x3]  }
  0x10   :  { %v45_v8 = vld [vmem:[#allocation0] sm:$0x3]  }
  0x12   :  { %34 = vrot.lane.b32.xlu0 %v33_v6, %s69_s13 }
  0x13   :  { %40 = vrot.lane.b32.xlu1 %v39_v7, %s70_s14 }
  0x16   :  { %46 = vrot.lane.b32.xlu0 %v45_v8, %s71_s15 }
  0x7c   :  { %v11_v9 = vpop.permute.xlu0 %10  }
  0x7d   :  { %v23_v10 = vpop.permute.xlu1 %22   ;;  %51 = vst.msk [vmem:[%s118_s1 + $0x1] ss:$8 sm:$0x3] %vm7_vm0, %v11_v9  }
  0x7e   :  { %53 = vst.msk [vmem:[%s118_s1 + $0x3] ss:$8 sm:$0x3] %vm7_vm0, %v23_v10  }
  0x80   :  { %v17_v11 = vpop.permute.xlu0 %16  }
  0x81   :  { %v29_v12 = vpop.permute.xlu1 %28   ;;  %52 = vst.msk [vmem:[%s118_s1 + $0x2] ss:$8 sm:$0x3] %vm7_vm0, %v17_v11  }
  0x82   :  { %54 = vst.msk [vmem:[%s118_s1 + $0x4] ss:$8 sm:$0x3] %vm7_vm0, %v29_v12  }
  0x84   :  { %v35_v13 = vpop.permute.xlu0 %34  }
  0x85   :  { %v41_v14 = vpop.permute.xlu1 %40   ;;  %55 = vst.msk [vmem:[%s118_s1 + $0x5] ss:$8 sm:$0x3] %vm7_vm0, %v35_v13  }
  0x86   :  { %56 = vst.msk [vmem:[%s118_s1 + $0x6] ss:$8 sm:$0x3] %vm7_vm0, %v41_v14  }
  0x88   :  { %v47_v15 = vpop.permute.xlu0 %46  }
  0x89   :  { %57 = vst.msk [vmem:[%s118_s1 + $0x7] ss:$8 sm:$0x3] %vm7_vm0, %v47_v15  }

// kernel: graph_conv_pallas.1
= control target key start
LH: loop header
LB: loop body
LE: loop exit
PB: predicated region body
PF: predicated region fallthrough
CT: control target
= control target key end

     0   :  { %v372_v1 = vmov 0   ;;  %s513_s1 = inlined_call_operand.vmem [shape: bf16[256,256], index: 1, kind: input, shape index: {}]   ;;  %s514_s0 = inlined_call_operand.vmem [shape: bf16[16,256], index: 0, kind: input, shape index: {}]   ;;  %s515_s2 = inlined_call_operand.vmem [shape: f32[16,1], index: 2, kind: input, shape index: {}]   ;;  %s516_s3 = inlined_call_operand.vmem [shape: f32[16,256], index: 3, kind: output, shape index: {}]  }
   0x1   :  { %v321_v0 = vld [vmem:[%s513_s1 + $0x4] ss:$8 sps:$4 sm:$0xff]   ;;  %320 = vset.pattern.permute.xlu0 %v372_v1  ;;  %v323_v2 = vld [vmem:[%s513_s1] ss:$8 sps:$4 sm:$0xff]   ;;  %v324_v3 = vld [vmem:[%s513_s1 + $0x14] ss:$8 sps:$4 sm:$0xff]  }
   0x2   :  { %230 = vmatprep.subr.bf16.mxu0 %v321_v0  ;;  %v326_v4 = vld [vmem:[%s513_s1 + $0x10] ss:$8 sps:$4 sm:$0xff]   ;;  %v327_v5 = vld [vmem:[%s513_s1 + $0x24] ss:$8 sps:$4 sm:$0xff]   ;;  %v329_v6 = vld [vmem:[%s513_s1 + $0x20] ss:$8 sps:$4 sm:$0xff]  }
   0x3   :  { %231 = vmatpush1.bf16.msra.mxu0 %v323_v2  ;;  %v330_v7 = vld [vmem:[%s513_s1 + $0x34] ss:$8 sps:$4 sm:$0xff]   ;;  %v332_v8 = vld [vmem:[%s513_s1 + $0x30] ss:$8 sps:$4 sm:$0xff]   ;;  %v333_v9 = vld [vmem:[%s513_s1 + $0x44] ss:$8 sps:$4 sm:$0xff]  }
   0x4   :  { %232 = vmatprep.subr.bf16.mxu0 %v324_v3  ;;  %v335_v10 = vld [vmem:[%s513_s1 + $0x40] ss:$8 sps:$4 sm:$0xff]   ;;  %v336_v11 = vld [vmem:[%s513_s1 + $0x54] ss:$8 sps:$4 sm:$0xff]   ;;  %v338_v12 = vld [vmem:[%s513_s1 + $0x50] ss:$8 sps:$4 sm:$0xff]  }
   0x5   :  { %v339_v13 = vld [vmem:[%s513_s1 + $0x64] ss:$8 sps:$4 sm:$0xff]   ;;  %v341_v16 = vld [vmem:[%s513_s1 + $0x60] ss:$8 sps:$4 sm:$0xff]   ;;  %v342_v17 = vld [vmem:[%s513_s1 + $0x74] ss:$8 sps:$4 sm:$0xff]  }
   0x6   :  { %v371_v14 = vld [vmem:[%s514_s0 + $0x4] ss:$8 sps:$4 sm:$0xff]   ;;  %v344_v19 = vld [vmem:[%s513_s1 + $0x70] ss:$8 sps:$4 sm:$0xff]   ;;  %v347_v21 = vld [vmem:[%s513_s1 + $0x80] ss:$8 sps:$4 sm:$0xff]  }
   0x7   :  { %233 = vmatpush1.bf16.msra.mxu0 %v326_v4  ;;  %v48_v15 = vld [vmem:[%s515_s2] sm:$0xff]  ;;  %262 = vmatprep.mubr.bf16.mxu0 %v371_v14  ;;  %v49_v18 = vld [vmem:[%s515_s2 + $0x8] sm:$0xff]  ;;  %v348_v22 = vld [vmem:[%s513_s1 + $0x94] ss:$8 sps:$4 sm:$0xff]  }
   0x8   :  { %234 = vmatprep.subr.bf16.mxu0 %v327_v5  ;;  %52 = vperm.xlu0 %320, %v48_v15   ;;  %v345_v20 = vld [vmem:[%s513_s1 + $0x84] ss:$8 sps:$4 sm:$0xff]   ;;  %v350_v23 = vld [vmem:[%s513_s1 + $0x90] ss:$8 sps:$4 sm:$0xff]   ;;  %v353_v25 = vld [vmem:[%s513_s1 + $0xa0] ss:$8 sps:$4 sm:$0xff]  }
   0x9   :  { %v351_v24 = vld [vmem:[%s513_s1 + $0xa4] ss:$8 sps:$4 sm:$0xff]   ;;  %v354_v26 = vld [vmem:[%s513_s1 + $0xb4] ss:$8 sps:$4 sm:$0xff]   ;;  %v356_v27 = vld [vmem:[%s513_s1 + $0xb0] ss:$8 sps:$4 sm:$0xff]  }
   0xa   :  { %v357_v28 = vld [vmem:[%s513_s1 + $0xc4] ss:$8 sps:$4 sm:$0xff]   ;;  %v359_v29 = vld [vmem:[%s513_s1 + $0xc0] ss:$8 sps:$4 sm:$0xff]   ;;  %v360_v30 = vld [vmem:[%s513_s1 + $0xd4] ss:$8 sps:$4 sm:$0xff]  }
   0xb   :  { %235 = vmatpush1.bf16.msra.mxu0 %v329_v6  ;;  %v362_v31 = vld [vmem:[%s513_s1 + $0xd0] ss:$8 sps:$4 sm:$0xff]   ;;  %v363_v32 = vld [vmem:[%s513_s1 + $0xe4] ss:$8 sps:$4 sm:$0xff]   ;;  %v365_v33 = vld [vmem:[%s513_s1 + $0xe0] ss:$8 sps:$4 sm:$0xff]  }
   0xc   :  { %236 = vmatprep.subr.bf16.mxu0 %v330_v7  ;;  %57 = vperm.xlu0 %320, %v49_v18   ;;  %v366_v34 = vld [vmem:[%s513_s1 + $0xf4] ss:$8 sps:$4 sm:$0xff]   ;;  %v368_v35 = vld [vmem:[%s513_s1 + $0xf0] ss:$8 sps:$4 sm:$0xff]   ;;  %v369_v36 = vld [vmem:[%s514_s0] ss:$8 sps:$4 sm:$0xff]  }
   0xf   :  { %237 = vmatpush1.bf16.msra.mxu0 %v332_v8 }
  0x10   :  { %238 = vmatprep.subr.bf16.mxu0 %v333_v9 }
  0x13   :  { %239 = vmatpush1.bf16.msra.mxu0 %v335_v10 }
  0x14   :  { %240 = vmatprep.subr.bf16.mxu0 %v336_v11 }
  0x17   :  { %241 = vmatpush1.bf16.msra.mxu0 %v338_v12 }
  0x18   :  { %242 = vmatprep.subr.bf16.mxu0 %v339_v13 }
  0x1b   :  { %243 = vmatpush1.bf16.msra.mxu0 %v341_v16 }
  0x1c   :  { %244 = vmatprep.subr.bf16.mxu0 %v342_v17 }
  0x1f   :  { %245 = vmatpush1.bf16.msra.mxu0 %v344_v19 }
  0x20   :  { %246 = vmatprep.subr.bf16.mxu0 %v345_v20 }
  0x23   :  { %247 = vmatpush1.bf16.msra.mxu0 %v347_v21 }
  0x24   :  { %248 = vmatprep.subr.bf16.mxu0 %v348_v22 }
  0x27   :  { %249 = vmatpush1.bf16.msra.mxu0 %v350_v23 }
  0x28   :  { %250 = vmatprep.subr.bf16.mxu0 %v351_v24 }
  0x2b   :  { %251 = vmatpush1.bf16.msra.mxu0 %v353_v25 }
  0x2c   :  { %252 = vmatprep.subr.bf16.mxu0 %v354_v26 }
  0x2f   :  { %253 = vmatpush1.bf16.msra.mxu0 %v356_v27 }
  0x30   :  { %254 = vmatprep.subr.bf16.mxu0 %v357_v28 }
  0x33   :  { %255 = vmatpush1.bf16.msra.mxu0 %v359_v29 }
  0x34   :  { %256 = vmatprep.subr.bf16.mxu0 %v360_v30 }
  0x37   :  { %257 = vmatpush1.bf16.msra.mxu0 %v362_v31 }
  0x38   :  { %258 = vmatprep.subr.bf16.mxu0 %v363_v32 }
  0x3b   :  { %259 = vmatpush1.bf16.msra.mxu0 %v365_v33 }
  0x3c   :  { %260 = vmatprep.subr.bf16.mxu0 %v366_v34 }
  0x3f   :  { %261 = vmatpush1.bf16.msra.mxu0 %v368_v35 }
  0x42   :  { %263 = vmatmul.mubr.bf16.vlgmr.msra.gmra.mrb[0].mxu0 %v369_v36 }
  0x87   :  { %v53_v37 = vpop.permute.xlu0 %52 }
  0x8b   :  { %v58_v41 = vpop.permute.xlu0 %57 }
 0x115   :  { %v264_v38 = vpop.f32.mrb[0].mxu0 }
 0x116   :  { %v265_v39 = vadd.f32 %v264_v38, %v53_v37  ;;  %v266_v40 = vpop.f32.mrb[1].mxu0 }
 0x117   :  { %v267_v42 = vadd.f32 %v266_v40, %v53_v37  ;;  %v268_v43 = vpop.f32.mrb[2].mxu0 }
 0x118   :  { %v273_v44 = vmax.f32 %v265_v39, 0.0  ;;  %v269_v45 = vadd.f32 %v268_v43, %v58_v41  ;;  %v270_v46 = vpop.f32.mrb[3].mxu0 }
 0x119   :  { %v274_v47 = vmax.f32 %v267_v42, 0.0  ;;  %v271_v48 = vadd.f32 %v270_v46, %v58_v41 }
 0x11a   :  { %277 = vst [vmem:[%s516_s3] sm:$0xff] %v273_v44  ;;  %v275_v49 = vmax.f32 %v269_v45, 0.0 }
 0x11b   :  { %278 = vst [vmem:[%s516_s3 + $0x8] sm:$0xff] %v274_v47  ;;  %v276_v50 = vmax.f32 %v271_v48, 0.0 }
 0x11c   :  { %279 = vst [vmem:[%s516_s3 + $0x10] sm:$0xff] %v275_v49 }
 0x11d   :  { %280 = vst [vmem:[%s516_s3 + $0x18] sm:$0xff] %v276_v50 }

</bundles_post_ra>
